<compile_context>
chip_gen: v7x
topology: tpu7x:2x2x1
jax: 0.10.0
libtpu: 0.0.40
codegen_flags: <defaults>
</compile_context>

<pallas_src>
import jax
import jax.numpy as jnp
from jax.experimental import pallas as pl
from jax.experimental.pallas import tpu as pltpu


def _round_up(x: int, m: int) -> int:
    return ((x + m - 1) // m) * m


def _vmem_budget_bytes() -> int:
    """Per-core VMEM budget with headroom for Mosaic internal scratch/semaphores."""
    try:
        cap = int(pltpu.get_tpu_info().vmem_capacity_bytes)
    except Exception:
        cap = 64 * 1024 * 1024          # conservative: v7x per-core VMEM
    return int(cap * 0.8)               # ~51 MiB on v7x, ~102 MiB on v5e/v6e


# --------------------------------------------------------------------------------------
# Kernels
# --------------------------------------------------------------------------------------
def _flow_resident_kernel(x_ref, wc_ref, bc_ref, z_ref, jac_ref):
    """All S steps in one grid point; full weight stack resident in VMEM."""
    S = wc_ref.shape[0]
    Dp = x_ref.shape[1]

    x = x_ref[...].astype(jnp.float32)                       # [TB, Dp] f32 carry
    jac = jnp.zeros((x_ref.shape[0], 1), jnp.float32)        # reduced accumulator

    def step(k, x, jac):
        # bf16 LHS for the MXU; error grows ~linearly in S (documented, fine here).
        pre = jnp.dot(x.astype(jnp.bfloat16), wc_ref[k],
                      preferred_element_type=jnp.float32) + bc_ref[k]   # [TB, 2*Dp]
        s = jnp.tanh(pre[:, :Dp])                             # s-half (f32 transcendentals)
        t = pre[:, Dp:]                                       # t-half
        x = x * jnp.exp(s) + t                                # next-step input (folded frame)
        jac = jac + jnp.sum(s, axis=1, keepdims=True)         # XLU reduce per step
        return x, jac

    if S <= 8:                                                # unroll short flows (LLO visibility)
        for k in range(S):
            x, jac = step(k, x, jac)
    else:
        x, jac = jax.lax.fori_loop(0, S, lambda k, c: step(k, *c), (x, jac))

    z_ref[...] = x.astype(z_ref.dtype)
    jac_ref[...] = jnp.broadcast_to(jac, jac_ref.shape)       # lane-dense [TB, 128] store


def _flow_stream_kernel(x_ref, wc_ref, bc_ref, z_ref, jac_ref, x_carry, jac_acc):
    """Fallback: one step per grid point along axis 1; weights streamed, state in scratch."""
    k = pl.program_id(1)
    Dp = x_ref.shape[1]

    @pl.when(k == 0)
    def _():
        x_carry[...] = x_ref[...].astype(jnp.float32)
        jac_acc[...] = jnp.zeros_like(jac_acc)

    x = x_carry[...]
    pre = jnp.dot(x.astype(jnp.bfloat16), wc_ref[0],
                  preferred_element_type=jnp.float32) + bc_ref[0]
    s = jnp.tanh(pre[:, :Dp])
    t = pre[:, Dp:]
    x_carry[...] = x * jnp.exp(s) + t
    jac_acc[...] = jac_acc[...] + jnp.sum(s, axis=1, keepdims=True)

    @pl.when(k == pl.num_programs(1) - 1)
    def _():
        z_ref[...] = x_carry[...].astype(z_ref.dtype)
        jac_ref[...] = jac_acc[...]


# --------------------------------------------------------------------------------------
# Host-side parameter preparation (call ONCE per model — hoisted out of the forward path)
# --------------------------------------------------------------------------------------
def prepare_flow_params(ws, bs, wt, bt):
    """Fold the per-step reversal into the weights, concat Ws||Wt (bs||bt), pad lane-dense.

    ws/wt: [S, D, D], bs/bt: [S, 1, D].
    Returns (wc [S, Dp, 2*Dp] bf16, bc [S, 1, 2*Dp] f32, D).
    """
    S, D, _ = ws.shape
    Dp = _round_up(max(D, 128), 128)

    ws = ws.astype(jnp.float32); wt = wt.astype(jnp.float32)
    bs = bs.astype(jnp.float32); bt = bt.astype(jnp.float32)

    # Fold x -> z[:, ::-1] into the weights: odd steps get P@W@P and b@P.
    flip = (jnp.arange(S) % 2) == 1
    ws_f = jnp.where(flip[:, None, None], ws[:, ::-1, ::-1], ws)
    wt_f = jnp.where(flip[:, None, None], wt[:, ::-1, ::-1], wt)
    bs_f = jnp.where(flip[:, None, None], bs[:, :, ::-1], bs)
    bt_f = jnp.where(flip[:, None, None], bt[:, :, ::-1], bt)

    # Concatenate along N so one matmul produces both s- and t- pre-activations.
    wc = jnp.zeros((S, Dp, 2 * Dp), jnp.bfloat16)
    wc = wc.at[:, :D, :D].set(ws_f.astype(jnp.bfloat16))
    wc = wc.at[:, :D, Dp:Dp + D].set(wt_f.astype(jnp.bfloat16))
    bc = jnp.zeros((S, 1, 2 * Dp), jnp.float32)
    bc = bc.at[:, :, :D].set(bs_f)
    bc = bc.at[:, :, Dp:Dp + D].set(bt_f)
    return wc, bc, D


# --------------------------------------------------------------------------------------
# Forward
# --------------------------------------------------------------------------------------
def fc_normalizing_flow_forward(x, wc, bc, D, *, batch_tile=256):
    """x: [B, D]; (wc, bc, D) from prepare_flow_params. Returns (z [B, D], jac_tot [B])."""
    B = x.shape[0]
    S, Dp, _ = wc.shape

    # Batch tiling: sublane-aligned, and >=2 tiles whenever B > 8 (v7x megacore).
    TB = min(_round_up(B, 8), batch_tile)
    if B > 8:
        TB = min(TB, _round_up(-(-B // 2), 8))
    Bp = _round_up(B, TB)
    nb = Bp // TB

    xp = jnp.zeros((Bp, Dp), jnp.float32).at[:B, :D].set(x.astype(jnp.float32))

    budget = _vmem_budget_bytes()
    wc_bytes = int(wc.size) * 2
    bc_bytes = int(bc.size) * 4
    tile_bytes = 2 * (TB * Dp * 4) * 2 + 2 * (TB * 128 * 4)     # x in + z out (dbl-buf) + jac out
    tmp_bytes = 8 * TB * Dp * 4                                  # in-kernel temporaries headroom
    resident_est = 2 * (wc_bytes + bc_bytes) + tile_bytes + tmp_bytes
    use_resident = resident_est <= budget

    out_shape = (jax.ShapeDtypeStruct((Bp, Dp), jnp.float32),
                 jax.ShapeDtypeStruct((Bp, 128), jnp.float32))
    cparams = pltpu.CompilerParams(
        dimension_semantics=("parallel",) if use_resident else ("parallel", "arbitrary"),
        vmem_limit_bytes=int(budget))

    if use_resident:
        z_pad, jac_pad = pl.pallas_call(
            _flow_resident_kernel,
            out_shape=out_shape,
            grid_spec=pltpu.PrefetchScalarGridSpec(
                num_scalar_prefetch=0,
                grid=(nb,),
                in_specs=[
                    pl.BlockSpec((TB, Dp), lambda b: (b, 0)),            # x batch tile
                    pl.BlockSpec((S, Dp, 2 * Dp), lambda b: (0, 0, 0)),  # full resident weights
                    pl.BlockSpec((S, 1, 2 * Dp), lambda b: (0, 0, 0)),   # full resident biases
                ],
                out_specs=(
                    pl.BlockSpec((TB, Dp), lambda b: (b, 0)),
                    pl.BlockSpec((TB, 128), lambda b: (b, 0)),
                ),
            ),
            compiler_params=cparams,
        )(xp, wc, bc)
    else:
        # Streaming fallback for weight stacks too large for VMEM residency.
        z_pad, jac_pad = pl.pallas_call(
            _flow_stream_kernel,
            out_shape=out_shape,
            grid_spec=pltpu.PrefetchScalarGridSpec(
                num_scalar_prefetch=0,
                grid=(nb, S),
                in_specs=[
                    pl.BlockSpec((TB, Dp), lambda b, k: (b, 0)),
                    pl.BlockSpec((1, Dp, 2 * Dp), lambda b, k: (k, 0, 0)),
                    pl.BlockSpec((1, 1, 2 * Dp), lambda b, k: (k, 0, 0)),
                ],
                out_specs=(
                    pl.BlockSpec((TB, Dp), lambda b, k: (b, 0)),
                    pl.BlockSpec((TB, 128), lambda b, k: (b, 0)),
                ),
                scratch_shapes=[
                    pltpu.VMEM((TB, Dp), jnp.float32),    # x carry
                    pltpu.VMEM((TB, 128), jnp.float32),   # jac accumulator (reduced per step)
                ],
            ),
            compiler_params=cparams,
        )(xp, wc, bc)

    z = z_pad[:B, :D]
    if S % 2 == 0:                 # single final reversal; parity folded into the weights
        z = z[:, ::-1]
    jac = jac_pad[:B, 0]
    return z, jac


# --------------------------------------------------------------------------------------
# Pure-JAX reference (mirrors FCNormalizingFlow.forward with explicit per-step reversal)
# --------------------------------------------------------------------------------------
def _reference_forward(x, ws, bs, wt, bt, matmul_dtype=jnp.float32):
    S = ws.shape[0]
    jac_tot = jnp.zeros((x.shape[0],), jnp.float32)
    z = x
    for k in range(S):
        pre_s = jnp.dot(x.astype(matmul_dtype), ws[k].astype(matmul_dtype),
                        preferred_element_type=jnp.float32) + bs[k]
        s = jnp.tanh(pre_s)
        t = jnp.dot(x.astype(matmul_dtype), wt[k].astype(matmul_dtype),
                    preferred_element_type=jnp.float32) + bt[k]
        z = x * jnp.exp(s) + t
        jac_tot = jac_tot + jnp.sum(s, axis=1)
        x = z[:, ::-1]
    return z, jac_tot


if __name__ == "__main__":
    B, D, S = 8, 16, 3

    key = jax.random.PRNGKey(0)
    kx, kws, kbs, kwt, kbt = jax.random.split(key, 5)
    x = jax.random.normal(kx, (B, D), dtype=jnp.float32)
    ws = 0.1 * jax.random.normal(kws, (S, D, D), dtype=jnp.float32)
    bs = 0.1 * jax.random.normal(kbs, (S, 1, D), dtype=jnp.float32)
    wt = 0.1 * jax.random.normal(kwt, (S, D, D), dtype=jnp.float32)
    bt = 0.1 * jax.random.normal(kbt, (S, 1, D), dtype=jnp.float32)

    # Parameter preparation is hoisted out of the per-forward path (do once per model).
    wc, bc, D_feat = prepare_flow_params(ws, bs, wt, bt)
    wc, bc = jax.block_until_ready(wc), jax.block_until_ready(bc)

    z, jac = fc_normalizing_flow_forward(x, wc, bc, D_feat)
    z = jax.block_until_ready(z)
    jac = jax.block_until_ready(jac)

    # Tight check: reference mirroring the kernel's numerics (bf16 matmul, f32 rest).
    z_bf, jac_bf = _reference_forward(x, ws, bs, wt, bt, matmul_dtype=jnp.bfloat16)
    assert jnp.allclose(z, z_bf, atol=2e-3, rtol=2e-3)
    assert jnp.allclose(jac, jac_bf, atol=2e-3, rtol=2e-3)

    # Loose check: full-f32 reference (bf16 matmul noise only).
    z_f32, jac_f32 = _reference_forward(x, ws, bs, wt, bt, matmul_dtype=jnp.float32)
    assert jnp.allclose(z, z_f32, atol=5e-2, rtol=5e-2)
    assert jnp.allclose(jac, jac_f32, atol=5e-2, rtol=5e-2)

    print("KERNEL_OK")
</pallas_src>

<mosaic_0001>
module attributes {stable_mosaic.version = 11 : i64} {
  func.func @_flow_resident_kernel(%arg0: i32, %arg1: memref<8x128xf32, #tpu.memory_space<vmem>>, %arg2: memref<3x128x256xbf16, #tpu.memory_space<vmem>>, %arg3: memref<3x1x256xf32, #tpu.memory_space<vmem>>, %arg4: memref<8x128xf32, #tpu.memory_space<vmem>>, %arg5: memref<8x128xf32, #tpu.memory_space<vmem>>) attributes {dimension_semantics = [#tpu.dimension_semantics<parallel>], iteration_bounds = array<i64: 1>, scalar_prefetch = 0 : i64, scratch_operands = 0 : i64, tpu.core_type = #tpu.core_type<tc>, window_params = [{transform_indices = @transform_0, window_bounds = array<i64: 8, 128>}, {pipeline_mode = #tpu.pipeline_mode<synchronous>, transform_indices = @transform_1, window_bounds = array<i64: 3, 128, 256>}, {pipeline_mode = #tpu.pipeline_mode<synchronous>, transform_indices = @transform_2, window_bounds = array<i64: 3, 1, 256>}, {transform_indices = @transform_3, window_bounds = array<i64: 8, 128>}, {transform_indices = @transform_4, window_bounds = array<i64: 8, 128>}]} {
    %c0 = arith.constant 0 : index
    %c0_0 = arith.constant 0 : index
    %0 = vector.load %arg1[%c0, %c0_0] : memref<8x128xf32, #tpu.memory_space<vmem>>, vector<8x128xf32>
    %cst = arith.constant 0.000000e+00 : f32
    %1 = vector.broadcast %cst : f32 to vector<8x1xf32>
    %2 = arith.truncf %0 : vector<8x128xf32> to vector<8x128xbf16>
    %c0_1 = arith.constant 0 : index
    %c0_2 = arith.constant 0 : index
    %c0_3 = arith.constant 0 : index
    %3 = vector.load %arg2[%c0_1, %c0_2, %c0_3] : memref<3x128x256xbf16, #tpu.memory_space<vmem>>, vector<1x128x256xbf16>
    %4 = vector.shape_cast %3 : vector<1x128x256xbf16> to vector<128x256xbf16>
    %cst_4 = arith.constant dense<0.000000e+00> : vector<8x256xf32>
    %5 = tpu.matmul %2, %4, %cst_4 {dimension_numbers = #tpu.dot_dimension_numbers<[1], [0], [0], [1], [0, 0, 1, 1], [], []>} : vector<8x128xbf16>, vector<128x256xbf16>, vector<8x256xf32> -> vector<8x256xf32>
    %c0_5 = arith.constant 0 : index
    %c0_6 = arith.constant 0 : index
    %c0_7 = arith.constant 0 : index
    %6 = vector.load %arg3[%c0_5, %c0_6, %c0_7] : memref<3x1x256xf32, #tpu.memory_space<vmem>>, vector<1x1x256xf32>
    %7 = vector.shape_cast %6 : vector<1x1x256xf32> to vector<1x256xf32>
    %8 = vector.broadcast %7 : vector<1x256xf32> to vector<8x256xf32>
    %9 = arith.addf %5, %8 : vector<8x256xf32>
    %10 = vector.extract_strided_slice %9 {offsets = [0, 0], sizes = [8, 128], strides = [1, 1]} : vector<8x256xf32> to vector<8x128xf32>
    %11 = math.tanh %10 : vector<8x128xf32>
    %12 = vector.extract_strided_slice %9 {offsets = [0, 128], sizes = [8, 128], strides = [1, 1]} : vector<8x256xf32> to vector<8x128xf32>
    %13 = math.exp %11 : vector<8x128xf32>
    %14 = arith.mulf %0, %13 : vector<8x128xf32>
    %15 = arith.addf %14, %12 : vector<8x128xf32>
    %cst_8 = arith.constant dense<0.000000e+00> : vector<8xf32>
    %16 = vector.multi_reduction <add>, %11, %cst_8 [1] : vector<8x128xf32> to vector<8xf32>
    %17 = vector.shape_cast %16 : vector<8xf32> to vector<8x1xf32>
    %18 = arith.addf %1, %17 : vector<8x1xf32>
    %19 = arith.truncf %15 : vector<8x128xf32> to vector<8x128xbf16>
    %c1 = arith.constant 1 : index
    %c0_9 = arith.constant 0 : index
    %c0_10 = arith.constant 0 : index
    %20 = vector.load %arg2[%c1, %c0_9, %c0_10] : memref<3x128x256xbf16, #tpu.memory_space<vmem>>, vector<1x128x256xbf16>
    %21 = vector.shape_cast %20 : vector<1x128x256xbf16> to vector<128x256xbf16>
    %cst_11 = arith.constant dense<0.000000e+00> : vector<8x256xf32>
    %22 = tpu.matmul %19, %21, %cst_11 {dimension_numbers = #tpu.dot_dimension_numbers<[1], [0], [0], [1], [0, 0, 1, 1], [], []>} : vector<8x128xbf16>, vector<128x256xbf16>, vector<8x256xf32> -> vector<8x256xf32>
    %c1_12 = arith.constant 1 : index
    %c0_13 = arith.constant 0 : index
    %c0_14 = arith.constant 0 : index
    %23 = vector.load %arg3[%c1_12, %c0_13, %c0_14] : memref<3x1x256xf32, #tpu.memory_space<vmem>>, vector<1x1x256xf32>
    %24 = vector.shape_cast %23 : vector<1x1x256xf32> to vector<1x256xf32>
    %25 = vector.broadcast %24 : vector<1x256xf32> to vector<8x256xf32>
    %26 = arith.addf %22, %25 : vector<8x256xf32>
    %27 = vector.extract_strided_slice %26 {offsets = [0, 0], sizes = [8, 128], strides = [1, 1]} : vector<8x256xf32> to vector<8x128xf32>
    %28 = math.tanh %27 : vector<8x128xf32>
    %29 = vector.extract_strided_slice %26 {offsets = [0, 128], sizes = [8, 128], strides = [1, 1]} : vector<8x256xf32> to vector<8x128xf32>
    %30 = math.exp %28 : vector<8x128xf32>
    %31 = arith.mulf %15, %30 : vector<8x128xf32>
    %32 = arith.addf %31, %29 : vector<8x128xf32>
    %cst_15 = arith.constant dense<0.000000e+00> : vector<8xf32>
    %33 = vector.multi_reduction <add>, %28, %cst_15 [1] : vector<8x128xf32> to vector<8xf32>
    %34 = vector.shape_cast %33 : vector<8xf32> to vector<8x1xf32>
    %35 = arith.addf %18, %34 : vector<8x1xf32>
    %36 = arith.truncf %32 : vector<8x128xf32> to vector<8x128xbf16>
    %c2 = arith.constant 2 : index
    %c0_16 = arith.constant 0 : index
    %c0_17 = arith.constant 0 : index
    %37 = vector.load %arg2[%c2, %c0_16, %c0_17] : memref<3x128x256xbf16, #tpu.memory_space<vmem>>, vector<1x128x256xbf16>
    %38 = vector.shape_cast %37 : vector<1x128x256xbf16> to vector<128x256xbf16>
    %cst_18 = arith.constant dense<0.000000e+00> : vector<8x256xf32>
    %39 = tpu.matmul %36, %38, %cst_18 {dimension_numbers = #tpu.dot_dimension_numbers<[1], [0], [0], [1], [0, 0, 1, 1], [], []>} : vector<8x128xbf16>, vector<128x256xbf16>, vector<8x256xf32> -> vector<8x256xf32>
    %c2_19 = arith.constant 2 : index
    %c0_20 = arith.constant 0 : index
    %c0_21 = arith.constant 0 : index
    %40 = vector.load %arg3[%c2_19, %c0_20, %c0_21] : memref<3x1x256xf32, #tpu.memory_space<vmem>>, vector<1x1x256xf32>
    %41 = vector.shape_cast %40 : vector<1x1x256xf32> to vector<1x256xf32>
    %42 = vector.broadcast %41 : vector<1x256xf32> to vector<8x256xf32>
    %43 = arith.addf %39, %42 : vector<8x256xf32>
    %44 = vector.extract_strided_slice %43 {offsets = [0, 0], sizes = [8, 128], strides = [1, 1]} : vector<8x256xf32> to vector<8x128xf32>
    %45 = math.tanh %44 : vector<8x128xf32>
    %46 = vector.extract_strided_slice %43 {offsets = [0, 128], sizes = [8, 128], strides = [1, 1]} : vector<8x256xf32> to vector<8x128xf32>
    %47 = math.exp %45 : vector<8x128xf32>
    %48 = arith.mulf %32, %47 : vector<8x128xf32>
    %49 = arith.addf %48, %46 : vector<8x128xf32>
    %cst_22 = arith.constant dense<0.000000e+00> : vector<8xf32>
    %50 = vector.multi_reduction <add>, %45, %cst_22 [1] : vector<8x128xf32> to vector<8xf32>
    %51 = vector.shape_cast %50 : vector<8xf32> to vector<8x1xf32>
    %52 = arith.addf %35, %51 : vector<8x1xf32>
    %c0_23 = arith.constant 0 : index
    %c0_24 = arith.constant 0 : index
    %53 = vector.load %arg4[%c0_23, %c0_24] : memref<8x128xf32, #tpu.memory_space<vmem>>, vector<8x128xf32>
    tpu.vector_store %arg4[%c0_23, %c0_24], %49 {strides = array<i32>} : memref<8x128xf32, #tpu.memory_space<vmem>>, vector<8x128xf32>,
    %54 = vector.shape_cast %52 : vector<8x1xf32> to vector<8x1xf32>
    %55 = vector.broadcast %54 : vector<8x1xf32> to vector<8x128xf32>
    %c0_25 = arith.constant 0 : index
    %c0_26 = arith.constant 0 : index
    %56 = vector.load %arg5[%c0_25, %c0_26] : memref<8x128xf32, #tpu.memory_space<vmem>>, vector<8x128xf32>
    tpu.vector_store %arg5[%c0_25, %c0_26], %55 {strides = array<i32>} : memref<8x128xf32, #tpu.memory_space<vmem>>, vector<8x128xf32>,
    return
  }
  func.func @transform_0(%arg0: i32) -> (i32, i32) {
    %c0_i32 = arith.constant 0 : i32
    %c0_i32_0 = arith.constant 0 : i32
    return %arg0, %c0_i32 : i32, i32
  }
  func.func @transform_1(%arg0: i32) -> (i32, i32, i32) {
    %c0_i32 = arith.constant 0 : i32
    %c0_i32_0 = arith.constant 0 : i32
    %c0_i32_1 = arith.constant 0 : i32
    %c0_i32_2 = arith.constant 0 : i32
    return %c0_i32, %c0_i32_0, %c0_i32_1 : i32, i32, i32
  }
  func.func @transform_2(%arg0: i32) -> (i32, i32, i32) {
    %c0_i32 = arith.constant 0 : i32
    %c0_i32_0 = arith.constant 0 : i32
    %c0_i32_1 = arith.constant 0 : i32
    %c0_i32_2 = arith.constant 0 : i32
    return %c0_i32, %c0_i32_0, %c0_i32_1 : i32, i32, i32
  }
  func.func @transform_3(%arg0: i32) -> (i32, i32) {
    %c0_i32 = arith.constant 0 : i32
    %c0_i32_0 = arith.constant 0 : i32
    return %arg0, %c0_i32 : i32, i32
  }
  func.func @transform_4(%arg0: i32) -> (i32, i32) {
    %c0_i32 = arith.constant 0 : i32
    %c0_i32_0 = arith.constant 0 : i32
    return %arg0, %c0_i32 : i32, i32
  }
}

</mosaic_0001>

<bundles_post_ra>
// kernel: tpu_custom_call.1
= control target key start
LH: loop header
LB: loop body
LE: loop exit
PB: predicated region body
PF: predicated region fallthrough
CT: control target
= control target key end

     0   :  { %10 = vsyncpa [#allocation3], 0  ;;  %s899_s0 = inlined_call_operand.hbm [shape: f32[8,128], index: 0, kind: input, shape index: {}]   ;;  %s900_s1 = inlined_call_operand.hbm [shape: bf16[3,128,256], index: 1, kind: input, shape index: {}]   ;;  %s901_s2 = inlined_call_operand.vmem [shape: f32[3,1,256], index: 2, kind: input, shape index: {}]   ;;  %s902_s3 = inlined_call_operand.hbm [shape: f32[8,128], index: 3, kind: output, shape index: {0}]   ;;  %s903_s4 = inlined_call_operand.hbm [shape: f32[8,128], index: 4, kind: output, shape index: {1}]  }
   0x1   :  { %11 = vsyncpa [#allocation6], 0 }
   0x2   :  { %12 = vsyncpa [#allocation4], 0 }
   0x3   :  { %13 = vsyncpa [#allocation9], 0  ;;  %s793_s15 = smov [#allocation2]   ;;  %s794_s17 = smov [#allocation5]  }
   0x4   :  { %s20_s16 = sshll.u32 %s793_s15, 4  ;;  %s29_s18 = sshll.u32 %s794_s17, 4  ;;  %s21_s16 = int_to_ptr.vmem [resolvable:$true] %s20_s16  ;;  %s825_s18 = int_to_ptr.vmem [resolvable:$true] %s29_s18 }
   0x5   :  { %s697_s21 = scalar_lea.hbm %s899_s0, 128 }
   0x6   :  { %p698_p0 = scmp.ne.s32.totalorder %s899_s0, %s697_s21  ;;  %p701_p1 = scmp.lt.u32.totalorder %s697_s21, %s899_s0 }
   0x8   :  { %p703_p2 = pnand %p701_p1, %p698_p0 }
   0xa   :  { %706 = shalt.err (!%p703_p2)
}
   0xb   :  { %s707_s26 = scalar_lea.vmem %s21_s16, 128  ;;  %p712_p4 = scmp.lt.s32.totalorder %s21_s16, %s21_s16 }
   0xc   :  { %p708_p3 = scmp.ne.s32.totalorder %s21_s16, %s707_s26  ;;  %p713_p5 = scmp.lt.s32.totalorder %s707_s26, %s707_s26 }
   0xe   :  { %p714_p6 = por %p713_p5, %p712_p4 }
  0x10   :  { %p715_p7 = pnand %p714_p6, %p708_p3 }
  0x12   :  { %718 = shalt.err (!%p715_p7)
}
  0x13   :  { %23 = dma.hbm_to_vmem [thread:$0]  %s899_s0, 128, %s21_s16, [#allocation3]  }
  0x14   :  { %s719_s5 = scalar_lea.hbm %s900_s1, 6144 }
  0x15   :  { %p720_p8 = scmp.ne.s32.totalorder %s900_s1, %s719_s5  ;;  %p723_p9 = scmp.lt.u32.totalorder %s719_s5, %s900_s1 }
  0x17   :  { %p725_p10 = pnand %p723_p9, %p720_p8 }
  0x19   :  { %728 = shalt.err (!%p725_p10)
}
  0x1a   :  { %s729_s10 = scalar_lea.vmem %s825_s18, 6144  ;;  %p734_p12 = scmp.lt.s32.totalorder %s825_s18, %s825_s18 }
  0x1b   :  { %p730_p11 = scmp.ne.s32.totalorder %s825_s18, %s729_s10  ;;  %p735_p13 = scmp.lt.s32.totalorder %s729_s10, %s729_s10 }
  0x1d   :  { %p736_p0 = por %p735_p13, %p734_p12 }
  0x1f   :  { %p737_p1 = pnand %p736_p0, %p730_p11 }
  0x21   :  { %740 = shalt.err (!%p737_p1)
}
  0x22   :  { %s795_s0 = smov 128   ;;  %s796_s11 = smov 8  }
  0x23   :  { %35 = dma.hbm_to_vmem [thread:$0]  %s900_s1, 6144, %s825_s18, [#allocation6], %s795_s0, %s795_s0, %s796_s11  }
  0x24   :  { %785 = dma.done.wait [#allocation3], 128  }
  0x25   :  { %786 = vsyncadd [#allocation3], 4294967168 }
  0x26   :  { %787 = dma.done.wait [#allocation6], 6144  }
  0x27   :  { %788 = vsyncadd [#allocation6], 4294961152  ;;  %v797_v0 = vmov 0   ;;  %v613_v1 = vld [vmem:[#allocation5 + $0x4] ss:$8 sps:$4 sm:$0xff]   ;;  %v45_v17 = vld [vmem:[#allocation2] sm:$0xff]  ;;  %v65_v35 = vlaneseq }
  0x28   :  { %187 = vmatprep.mubr.bf16.mxu0 %v797_v0  ;;  %347 = vmatprep.mubr.bf16.mxu1 %v797_v0  ;;  %v615_v2 = vld [vmem:[#allocation5] ss:$8 sps:$4 sm:$0xff]   ;;  %v616_v3 = vld [vmem:[#allocation5 + $0x14] ss:$8 sps:$4 sm:$0xff]   ;;  %v618_v4 = vld [vmem:[#allocation5 + $0x10] ss:$8 sps:$4 sm:$0xff]   ;;  %v46_v18 = vpack.c.bf16 %v45_v17, %v45_v17 }
  0x29   :  { %155 = vmatprep.subr.bf16.mxu0 %v613_v1  ;;  %v619_v5 = vld [vmem:[#allocation5 + $0x24] ss:$8 sps:$4 sm:$0xff]   ;;  %v621_v6 = vld [vmem:[#allocation5 + $0x20] ss:$8 sps:$4 sm:$0xff]   ;;  %v622_v7 = vld [vmem:[#allocation5 + $0x34] ss:$8 sps:$4 sm:$0xff]  }
  0x2a   :  { %156 = vmatpush1.bf16.msra.mxu0 %v615_v2  ;;  %v624_v8 = vld [vmem:[#allocation5 + $0x30] ss:$8 sps:$4 sm:$0xff]   ;;  %v625_v9 = vld [vmem:[#allocation5 + $0x44] ss:$8 sps:$4 sm:$0xff]   ;;  %v627_v10 = vld [vmem:[#allocation5 + $0x40] ss:$8 sps:$4 sm:$0xff]  }
  0x2b   :  { %157 = vmatprep.subr.bf16.mxu0 %v616_v3  ;;  %v628_v11 = vld [vmem:[#allocation5 + $0x54] ss:$8 sps:$4 sm:$0xff]   ;;  %v630_v12 = vld [vmem:[#allocation5 + $0x50] ss:$8 sps:$4 sm:$0xff]   ;;  %v631_v13 = vld [vmem:[#allocation5 + $0x64] ss:$8 sps:$4 sm:$0xff]  }
  0x2c   :  { %v633_v14 = vld [vmem:[#allocation5 + $0x60] ss:$8 sps:$4 sm:$0xff]   ;;  %v634_v15 = vld [vmem:[#allocation5 + $0x74] ss:$8 sps:$4 sm:$0xff]   ;;  %v636_v16 = vld [vmem:[#allocation5 + $0x70] ss:$8 sps:$4 sm:$0xff]  }
  0x2d   :  { %v637_v19 = vld [vmem:[#allocation5 + $0x84] ss:$8 sps:$4 sm:$0xff]   ;;  %v639_v20 = vld [vmem:[#allocation5 + $0x80] ss:$8 sps:$4 sm:$0xff]   ;;  %v640_v21 = vld [vmem:[#allocation5 + $0x94] ss:$8 sps:$4 sm:$0xff]  }
  0x2e   :  { %158 = vmatpush1.bf16.msra.mxu0 %v618_v4  ;;  %315 = vmatprep.subr.bf16.mxu1 %v637_v19  ;;  %v642_v22 = vld [vmem:[#allocation5 + $0x90] ss:$8 sps:$4 sm:$0xff]   ;;  %v643_v23 = vld [vmem:[#allocation5 + $0xa4] ss:$8 sps:$4 sm:$0xff]   ;;  %v645_v24 = vld [vmem:[#allocation5 + $0xa0] ss:$8 sps:$4 sm:$0xff]  }
  0x2f   :  { %159 = vmatprep.subr.bf16.mxu0 %v619_v5  ;;  %316 = vmatpush1.bf16.msra.mxu1 %v639_v20  ;;  %v646_v25 = vld [vmem:[#allocation5 + $0xb4] ss:$8 sps:$4 sm:$0xff]   ;;  %v648_v26 = vld [vmem:[#allocation5 + $0xb0] ss:$8 sps:$4 sm:$0xff]   ;;  %v649_v27 = vld [vmem:[#allocation5 + $0xc4] ss:$8 sps:$4 sm:$0xff]  }
  0x30   :  { %317 = vmatprep.subr.bf16.mxu1 %v640_v21  ;;  %v651_v28 = vld [vmem:[#allocation5 + $0xc0] ss:$8 sps:$4 sm:$0xff]   ;;  %v652_v29 = vld [vmem:[#allocation5 + $0xd4] ss:$8 sps:$4 sm:$0xff]   ;;  %v654_v30 = vld [vmem:[#allocation5 + $0xd0] ss:$8 sps:$4 sm:$0xff]  }
  0x31   :  { %v655_v31 = vld [vmem:[#allocation5 + $0xe4] ss:$8 sps:$4 sm:$0xff]   ;;  %v657_v32 = vld [vmem:[#allocation5 + $0xe0] ss:$8 sps:$4 sm:$0xff]   ;;  %v658_v33 = vld [vmem:[#allocation5 + $0xf4] ss:$8 sps:$4 sm:$0xff]  }
  0x32   :  { %160 = vmatpush1.bf16.msra.mxu0 %v621_v6  ;;  %v660_v34 = vld [vmem:[#allocation5 + $0xf0] ss:$8 sps:$4 sm:$0xff]   ;;  %v66_v36 = vshrl.u32 %v65_v35, 7  ;;  %v663_v54 = vld [vmem:[#allocation5 + $0x104] ss:$8 sps:$4 sm:$0xff]   ;;  %s798_s19 = smov [#allocation7]  }
  0x33   :  { %161 = vmatprep.subr.bf16.mxu0 %v622_v7  ;;  %318 = vmatpush1.bf16.msra.mxu1 %v642_v22  ;;  %v63_v38 = vld [vmem:[%s901_s2] sm:$0x3]  ;;  %v661_v55 = vld [vmem:[#allocation5 + $0x100] ss:$8 sps:$4 sm:$0xff]   ;;  %v666_v56 = vld [vmem:[#allocation5 + $0x114] ss:$8 sps:$4 sm:$0xff]  }
  0x34   :  { %319 = vmatprep.subr.bf16.mxu1 %v643_v23  ;;  %v856_v37 = vsub.s32 0, %v66_v36  ;;  %v862_v47 = vsub.s32 1, %v66_v36  ;;  %v664_v57 = vld [vmem:[#allocation5 + $0x110] ss:$8 sps:$4 sm:$0xff]   ;;  %v669_v58 = vld [vmem:[#allocation5 + $0x124] ss:$8 sps:$4 sm:$0xff]  }
  0x35   :  { %v667_v59 = vld [vmem:[#allocation5 + $0x120] ss:$8 sps:$4 sm:$0xff]   ;;  %v672_v60 = vld [vmem:[#allocation5 + $0x134] ss:$8 sps:$4 sm:$0xff]   ;;  %v670_v61 = vld [vmem:[#allocation5 + $0x130] ss:$8 sps:$4 sm:$0xff]  }
  0x36   :  { %162 = vmatpush1.bf16.msra.mxu0 %v624_v8  ;;  %v68_v39 = vrot.slane %v63_v38, %v856_v37  ;;  %v72_v48 = vrot.slane %v63_v38, %v862_v47  ;;  %v675_v62 = vld [vmem:[#allocation5 + $0x144] ss:$8 sps:$4 sm:$0xff]   ;;  %v673_v63 = vld [vmem:[#allocation5 + $0x140] ss:$8 sps:$4 sm:$0xff]   ;;  %v676_v1 = vld [vmem:[#allocation5 + $0x150] ss:$8 sps:$4 sm:$0xff]  }
  0x37   :  { %163 = vmatprep.subr.bf16.mxu0 %v625_v9  ;;  %320 = vmatpush1.bf16.msra.mxu1 %v645_v24  ;;  %v681_v2 = vld [vmem:[#allocation5 + $0x164] ss:$8 sps:$4 sm:$0xff]   ;;  %v679_v3 = vld [vmem:[#allocation5 + $0x160] ss:$8 sps:$4 sm:$0xff]   ;;  %v684_v4 = vld [vmem:[#allocation5 + $0x174] ss:$8 sps:$4 sm:$0xff]  }
  0x38   :  { %321 = vmatprep.subr.bf16.mxu1 %v646_v25  ;;  %v682_v5 = vld [vmem:[#allocation5 + $0x170] ss:$8 sps:$4 sm:$0xff]   ;;  %v589_v21 = vld [vmem:[%s901_s2 + $0x4] sm:$0x3] }
  0x39   :  { %v572_v6 = vld [vmem:[%s901_s2 + $0x2] sm:$0x3]  ;;  %v388_v22 = vrot.slane %v589_v21, %v856_v37  ;;  %s532_s2 = sshll.u32 %s798_s19, 4  ;;  %s533_s2 = int_to_ptr.vmem [resolvable:$true] %s532_s2 }
  0x3a   :  { %164 = vmatpush1.bf16.msra.mxu0 %v627_v10  ;;  %v228_v7 = vrot.slane %v572_v6, %v856_v37  ;;  %s741_s20 = scalar_lea.vmem %s533_s2, 128  ;;  %p746_p3 = scmp.lt.s32.totalorder %s533_s2, %s533_s2 }
  0x3b   :  { %165 = vmatprep.subr.bf16.mxu0 %v628_v11  ;;  %322 = vmatpush1.bf16.msra.mxu1 %v648_v26  ;;  %p742_p2 = scmp.ne.s32.totalorder %s533_s2, %s741_s20  ;;  %p747_p4 = scmp.lt.s32.totalorder %s741_s20, %s741_s20 }
  0x3c   :  { %323 = vmatprep.subr.bf16.mxu1 %v649_v27 }
  0x3d   :  { %p748_p5 = por %p747_p4, %p746_p3 }
  0x3e   :  { %166 = vmatpush1.bf16.msra.mxu0 %v630_v12 }
  0x3f   :  { %167 = vmatprep.subr.bf16.mxu0 %v631_v13  ;;  %324 = vmatpush1.bf16.msra.mxu1 %v651_v28  ;;  %p749_p6 = pnand %p748_p5, %p742_p2 }
  0x40   :  { %325 = vmatprep.subr.bf16.mxu1 %v652_v29 }
  0x42   :  { %168 = vmatpush1.bf16.msra.mxu0 %v633_v14 }
  0x43   :  { %169 = vmatprep.subr.bf16.mxu0 %v634_v15  ;;  %326 = vmatpush1.bf16.msra.mxu1 %v654_v30  ;;  %v232_v15 = vrot.slane %v572_v6, %v862_v47  ;;  %v392_v30 = vrot.slane %v589_v21, %v862_v47 }
  0x44   :  { %327 = vmatprep.subr.bf16.mxu1 %v655_v31 }
  0x46   :  { %170 = vmatpush1.bf16.msra.mxu0 %v636_v16 }
  0x47   :  { %328 = vmatpush1.bf16.msra.mxu1 %v657_v32  ;;  %475 = vmatprep.subr.bf16.mxu0 %v663_v54 }
  0x48   :  { %329 = vmatprep.subr.bf16.mxu1 %v658_v33 }
  0x49   :  { %188 = vmatmul.mubr.bf16.vlgmr.msra.gmra.mrb[0].mxu0 %v46_v18 }
  0x4a   :  { %507 = vmatprep.mubr.bf16.mxu0 %v797_v0  ;;  %476 = vmatpush1.bf16.msra.mxu0 %v661_v55  ;;  %v678_v0 = vld [vmem:[#allocation5 + $0x154] ss:$8 sps:$4 sm:$0xff]  }
  0x4b   :  { %330 = vmatpush1.bf16.msra.mxu1 %v660_v34  ;;  %477 = vmatprep.subr.bf16.mxu0 %v666_v56 }
  0x4e   :  { %478 = vmatpush1.bf16.msra.mxu0 %v664_v57 }
  0x4f   :  { %479 = vmatprep.subr.bf16.mxu0 %v669_v58 }
  0x52   :  { %480 = vmatpush1.bf16.msra.mxu0 %v667_v59 }
  0x53   :  { %481 = vmatprep.subr.bf16.mxu0 %v672_v60 }
  0x56   :  { %482 = vmatpush1.bf16.msra.mxu0 %v670_v61 }
  0x57   :  { %483 = vmatprep.subr.bf16.mxu0 %v675_v62 }
  0x5a   :  { %484 = vmatpush1.bf16.msra.mxu0 %v673_v63 }
  0x5b   :  { %485 = vmatprep.subr.bf16.mxu0 %v678_v0 }
  0x5e   :  { %486 = vmatpush1.bf16.msra.mxu0 %v676_v1 }
  0x5f   :  { %487 = vmatprep.subr.bf16.mxu0 %v681_v2 }
  0x62   :  { %488 = vmatpush1.bf16.msra.mxu0 %v679_v3 }
  0x63   :  { %489 = vmatprep.subr.bf16.mxu0 %v684_v4 }
  0x66   :  { %490 = vmatpush1.bf16.msra.mxu0 %v682_v5 }
 0x11c   :  { %v189_v40 = vpop.f32.mrb[0].mxu0 }
 0x11d   :  { %v190_v41 = vadd.f32 %v189_v40, %v68_v39  ;;  %v191_v42 = vpop.f32.mrb[1].mxu0 }
 0x11e   :  { %v193_v43 = vpop.f32.mrb[2].mxu0  ;;  %v192_v50 = vadd.f32 %v191_v42, %v72_v48 }
 0x11f   :  { %685 = vtanh.f32 %v190_v41  ;;  %v194_v44 = vpop.f32.mrb[3].mxu0 }
 0x129   :  { %v686_v45 = vpop.eup %685 }
 0x12a   :  { %v197_v46 = vmul.f32 1.442695, %v686_v45  ;;  %201 = vadd.xlane.f32.xlu0 %v686_v45 }
 0x12c   :  { %687 = vpow2.f32 %v197_v46 }
 0x136   :  { %v688_v49 = vpop.eup %687 }
 0x137   :  { %v199_v51 = vmul.f32 %v688_v49, %v45_v17 }
 0x139   :  { %v200_v52 = vadd.f32 %v199_v51, %v192_v50 }
 0x13b   :  { %v204_v53 = vpack.c.bf16 %v200_v52, %v200_v52 }
 0x13d   :  { %348 = vmatmul.mubr.bf16.vlgmr.msra.gmra.mrb[0].mxu1 %v204_v53 }
 0x210   :  { %v349_v8 = vpop.f32.mrb[0].mxu1 }
 0x211   :  { %v350_v9 = vadd.f32 %v349_v8, %v228_v7  ;;  %v351_v10 = vpop.f32.mrb[1].mxu1 }
 0x212   :  { %v353_v11 = vpop.f32.mrb[2].mxu1  ;;  %v352_v17 = vadd.f32 %v351_v10, %v232_v15 }
 0x213   :  { %689 = vtanh.f32 %v350_v9  ;;  %v354_v12 = vpop.f32.mrb[3].mxu1 }
 0x21d   :  { %v690_v13 = vpop.eup %689 }
 0x21e   :  { %v357_v14 = vmul.f32 1.442695, %v690_v13  ;;  %361 = vadd.xlane.f32.xlu0 %v690_v13 }
 0x220   :  { %691 = vpow2.f32 %v357_v14 }
 0x22a   :  { %v692_v16 = vpop.eup %691 }
 0x22b   :  { %v359_v18 = vmul.f32 %v692_v16, %v200_v52 }
 0x22d   :  { %v360_v19 = vadd.f32 %v359_v18, %v352_v17 }
 0x22f   :  { %v364_v20 = vpack.c.bf16 %v360_v19, %v360_v19 }
 0x231   :  { %508 = vmatmul.mubr.bf16.vlgmr.msra.gmra.mrb[4].mxu0 %v364_v20 }
 0x304   :  { %v509_v23 = vpop.f32.mrb[4].mxu0 }
 0x305   :  { %v510_v24 = vadd.f32 %v509_v23, %v388_v22  ;;  %v511_v25 = vpop.f32.mrb[5].mxu0 }
 0x306   :  { %v513_v26 = vpop.f32.mrb[6].mxu0  ;;  %v512_v32 = vadd.f32 %v511_v25, %v392_v30 }
 0x307   :  { %693 = vtanh.f32 %v510_v24  ;;  %v514_v27 = vpop.f32.mrb[7].mxu0 }
 0x311   :  { %v694_v28 = vpop.eup %693 }
 0x312   :  { %v517_v29 = vmul.f32 1.442695, %v694_v28  ;;  %521 = vadd.xlane.f32.xlu1 %v694_v28 }
 0x314   :  { %695 = vpow2.f32 %v517_v29 }
 0x31e   :  { %v696_v31 = vpop.eup %695 }
 0x31f   :  { %v519_v33 = vmul.f32 %v696_v31, %v360_v19 }
 0x321   :  { %v520_v34 = vadd.f32 %v519_v33, %v512_v32 }
 0x323   :  { %524 = vst [vmem:[#allocation7] sm:$0xff] %v520_v34 }
 0x324   :  { %752 = shalt.err (!%p749_p6)
}
 0x325   :  { %s753_s23 = scalar_lea.hbm %s902_s3, 128 }
 0x326   :  { %p754_p7 = scmp.ne.s32.totalorder %s902_s3, %s753_s23  ;;  %p757_p8 = scmp.lt.u32.totalorder %s753_s23, %s902_s3 }
 0x328   :  { %p759_p9 = pnand %p757_p8, %p754_p7 }
 0x32a   :  { %762 = shalt.err (!%p759_p9)
}
 0x32b   :  { %535 = dma.vmem_to_hbm [thread:$0]  %s533_s2, 128, %s902_s3, [#allocation4]   ;;  %v202_v35 = vpop.xlane.xlu0 %201 }
 0x32c   :  { %s799_s30 = smov [#allocation8]  }
 0x32d   :  { %s542_s5 = sshll.u32 %s799_s30, 4  ;;  %s543_s5 = int_to_ptr.vmem [resolvable:$true] %s542_s5 }
 0x32e   :  { %s763_s6 = scalar_lea.vmem %s543_s5, 128  ;;  %p768_p11 = scmp.lt.s32.totalorder %s543_s5, %s543_s5 }
 0x32f   :  { %v362_v36 = vpop.xlane.xlu0 %361  ;;  %p764_p10 = scmp.ne.s32.totalorder %s543_s5, %s763_s6  ;;  %p769_p12 = scmp.lt.s32.totalorder %s763_s6, %s763_s6 }
 0x330   :  { %v363_v37 = vadd.f32 %v362_v36, %v202_v35 }
 0x331   :  { %p770_p13 = por %p769_p12, %p768_p11 }
 0x333   :  { %p771_p0 = pnand %p770_p13, %p764_p10 }
 0x39f   :  { %v522_v38 = vpop.xlane.xlu1 %521 }
 0x3a0   :  { %v523_v39 = vadd.f32 %v522_v38, %v363_v37 }
 0x3a2   :  { %525 = vst [vmem:[#allocation8] sm:$0xff] %v523_v39 }
 0x3a3   :  { %774 = shalt.err (!%p771_p0)
}
 0x3a4   :  { %s775_s3 = scalar_lea.hbm %s903_s4, 128 }
 0x3a5   :  { %p776_p1 = scmp.ne.s32.totalorder %s903_s4, %s775_s3  ;;  %p779_p2 = scmp.lt.u32.totalorder %s775_s3, %s903_s4 }
 0x3a7   :  { %p781_p3 = pnand %p779_p2, %p776_p1 }
 0x3a9   :  { %784 = shalt.err (!%p781_p3)
}
 0x3aa   :  { %545 = dma.vmem_to_hbm [thread:$0]  %s543_s5, 128, %s903_s4, [#allocation9]  }
 0x3ab   :  { %789 = dma.done.wait [#allocation4], 128  }
 0x3ac   :  { %790 = vsyncadd [#allocation4], 4294967168 }
 0x3ad   :  { %791 = dma.done.wait [#allocation9], 128  }
 0x3ae   :  { %792 = vsyncadd [#allocation9], 4294967168 }
 0x3af   :  { %552 = vsyncpa [#allocation3], 1 }
 0x3b0   :  { %553 = vsyncpa [#allocation6], 1 }
 0x3b1   :  { %554 = vsyncpa [#allocation4], 1 }
 0x3b2   :  { %555 = vsyncpa [#allocation9], 1 }

</bundles_post_ra>
